<compile_context>
chip_gen: v5e
topology: v5e:2x2
jax: 0.10.0
libtpu: 0.0.40
codegen_flags: <defaults>
</compile_context>

<pallas_src>
import functools

import jax
import jax.numpy as jnp
from jax.experimental import pallas as pl
from jax.experimental.pallas import tpu as pltpu

_MAX_UNROLL_GROUPS = 128   # cap on unrolled row-groups in the reduction kernel

_CHIP_CFG = None


def _chip_config():
    """Per-generation block / VMEM budgets."""
    global _CHIP_CFG
    if _CHIP_CFG is not None:
        return _CHIP_CFG
    kind = ""
    try:
        kind = jax.devices()[0].device_kind.lower()
    except Exception:
        pass
    if ("v2" in kind) or ("v3" in kind):
        ceiling, dma = 12 << 20, 1 << 20            # tiny VMEM generations
    elif ("v4" in kind) or ("v5" in kind) or ("v6" in kind):
        ceiling, dma = 96 << 20, 8 << 20            # 128 MiB physical VMEM
    else:
        ceiling, dma = 48 << 20, 4 << 20            # v7x (64 MiB) / unknown
    try:
        cap = int(getattr(pltpu.get_tpu_info(), "vmem_capacity_bytes", 0))
        if cap > 0:
            ceiling = min(ceiling, int(cap * 0.7))
    except Exception:
        pass
    _CHIP_CFG = {"vmem_ceiling": int(ceiling), "dma_bytes": int(dma)}
    return _CHIP_CFG


def _row_group(itemsize):
    # Sublane packing: 8 rows per (8,128) tile for 4-byte, 16 for 2-byte, ...
    return {1: 32, 2: 16}.get(itemsize, 8)


def _smooth_l1_elem(pred_f32, tgt_f32, beta):
    diff = pred_f32 - tgt_f32
    absd = jnp.abs(diff)
    if beta == 0.0:
        return absd                                   # pure L1 (F.l1_loss)
    return jnp.where(absd < beta, diff * diff * (0.5 / beta), absd - 0.5 * beta)


# --------------------------------------------------------------------------
# Kernels
# --------------------------------------------------------------------------
def _elem_kernel(p_ref, t_ref, o_ref, *, beta, weight):
    """reduction='none': elementwise loss; weight & output cast fused."""
    loss = _smooth_l1_elem(p_ref[...].astype(jnp.float32),
                           t_ref[...].astype(jnp.float32), beta)
    o_ref[...] = (weight * loss).astype(o_ref.dtype)


def _partial_sum_kernel(p_ref, t_ref, o_ref, *, beta, grp, block_rows,
                        rows_total):
    """reduction='sum'/'mean': write an (8, lanes) f32 partial-sum tile per
    grid step.  The loss is computed per sublane row-group and accumulated
    immediately (no block-sized f32 temporary); only row-groups that can
    straddle the array boundary get a tiny (grp, 1) iota mask."""
    rows_in_last = rows_total % block_rows            # 0 -> grid divides exactly
    need_mask = rows_in_last != 0
    if need_mask:
        i = pl.program_id(0)
        sub_iota = jax.lax.broadcasted_iota(jnp.int32, (grp, 1), 0)

    acc = None
    for r0 in range(0, block_rows, grp):
        p = p_ref[r0:r0 + grp, :].astype(jnp.float32)
        t = t_ref[r0:r0 + grp, :].astype(jnp.float32)
        loss = _smooth_l1_elem(p, t, beta)
        if need_mask and (r0 + grp > rows_in_last):
            # Only possible boundary groups; in non-last blocks limit >= grp,
            # so the select is a no-op there.
            limit = rows_total - i * block_rows - r0
            loss = jnp.where(sub_iota < limit, loss, 0.0)
        acc = loss if acc is None else acc + loss

    # Fold the (grp, lanes) f32 accumulator down to an (8, lanes) output tile.
    while acc.shape[0] > 8:
        half = acc.shape[0] // 2
        acc = acc[:half, :] + acc[half:, :]
    o_ref[...] = acc


# --------------------------------------------------------------------------
# Block sizing
# --------------------------------------------------------------------------
def _pick_lanes(n_main, grp):
    for lw in (1024, 512, 256, 128):
        if n_main % lw == 0 and n_main // lw >= grp:
            return lw
    return 128


def _block_rows_for(rows, lanes, itemsize, grp, dma_bytes, usable_bytes,
                    per_elem_bytes, max_groups=None):
    """Pick block_rows: multiple of grp, sized by VMEM/DMA byte budgets,
    guaranteeing >= 2 grid blocks when possible (v7x 2-TC sharding), and
    preferring an exact divisor of `rows` near the target (no boundary)."""
    max_elems = max(grp * lanes,
                    min(dma_bytes // itemsize, usable_bytes // per_elem_bytes))
    tgt = max(grp, (max_elems // lanes) // grp * grp)
    if max_groups is not None:
        tgt = min(tgt, max_groups * grp)
    if rows > grp:
        half = -(-((rows + 1) // 2) // grp) * grp     # roundup(ceil(rows/2), grp)
        tgt = min(tgt, max(grp, half))
    tgt = min(tgt, -(-rows // grp) * grp)
    tgt = max(grp, tgt)
    if rows % grp == 0 and rows > grp:
        lo = max(grp, (tgt * 3) // 4)
        for cand in range(tgt, lo - 1, -grp):
            if rows % cand == 0:
                return cand                            # exact: no mask needed
    return tgt


# --------------------------------------------------------------------------
# Wrapper
# --------------------------------------------------------------------------
def _finish_plain(loss_f32, n, orig_shape, orig_dtype, reduction, weight):
    if reduction == 'none':
        return (weight * loss_f32).astype(orig_dtype).reshape(orig_shape)
    total = jnp.sum(loss_f32, dtype=jnp.float32)
    if reduction == 'mean':
        total = total / jnp.float32(n)                 # n==0 -> nan (matches torch)
    return (weight * total).astype(orig_dtype)


def smooth_l1_loss(predictions, targets, *, beta=1.0, reduction='mean',
                   weight=1.0):
    if predictions.shape != targets.shape:
        raise ValueError("predictions and targets must have the same shape")
    if reduction not in ('none', 'mean', 'sum'):
        raise ValueError(f"Unsupported reduction: {reduction}")
    beta = float(beta)
    weight = float(weight)

    orig_shape = predictions.shape
    orig_dtype = predictions.dtype
    n = int(predictions.size)
    itemsize = jnp.dtype(orig_dtype).itemsize
    grp = _row_group(itemsize)

    flat_p = predictions.reshape(-1)
    flat_t = targets.reshape(-1)

    rem = n % 128
    n_main = n - rem
    use_kernel = n_main > 0 and (n_main // 128) >= grp

    if not use_kernel:
        # Tiny input: a kernel launch is pure overhead; compute in plain JAX.
        loss = _smooth_l1_elem(flat_p.astype(jnp.float32),
                               flat_t.astype(jnp.float32), beta)
        return _finish_plain(loss, n, orig_shape, orig_dtype, reduction, weight)

    cfg = _chip_config()
    usable = max(cfg["vmem_ceiling"] - (12 << 20), cfg["vmem_ceiling"] // 2)
    lanes = _pick_lanes(n_main, grp)
    rows = n_main // lanes

    if rem:
        # Kernel handles the 128-aligned prefix; the tiny tail is plain JAX.
        p_main = flat_p[:n_main]
        t_main = flat_t[:n_main]
        tail_p = flat_p[n_main:]
        tail_t = flat_t[n_main:]
    else:
        p_main, t_main = flat_p, flat_t
        tail_p = tail_t = None
    p2d = p_main.reshape(rows, lanes)       # reshape of contiguous array: free
    t2d = t_main.reshape(rows, lanes)

    if reduction == 'none':
        block_rows = _block_rows_for(rows, lanes, itemsize, grp,
                                     cfg["dma_bytes"], usable,
                                     per_elem_bytes=6 * itemsize + 16)
        num_blocks = pl.cdiv(rows, block_rows)
        in_spec = pl.BlockSpec((block_rows, lanes), lambda i: (i, 0))
        out2d = pl.pallas_call(
            functools.partial(_elem_kernel, beta=beta, weight=weight),
            out_shape=jax.ShapeDtypeStruct((rows, lanes), orig_dtype),
            grid=(num_blocks,),
            in_specs=[in_spec, in_spec],
            out_specs=pl.BlockSpec((block_rows, lanes), lambda i: (i, 0)),
            compiler_params=pltpu.CompilerParams(
                dimension_semantics=("parallel",),
                vmem_limit_bytes=cfg["vmem_ceiling"]),
        )(p2d, t2d)
        out_flat = out2d.reshape(-1)
        if rem:
            tail_loss = weight * _smooth_l1_elem(tail_p.astype(jnp.float32),
                                                 tail_t.astype(jnp.float32),
                                                 beta)
            out_flat = jnp.concatenate([out_flat, tail_loss.astype(orig_dtype)])
        return out_flat.reshape(orig_shape)

    # 'sum' / 'mean': per-block lane-dense (8, lanes) partial sums.
    block_rows = _block_rows_for(rows, lanes, itemsize, grp,
                                 cfg["dma_bytes"], usable,
                                 per_elem_bytes=4 * itemsize + 2,
                                 max_groups=_MAX_UNROLL_GROUPS)
    num_blocks = pl.cdiv(rows, block_rows)
    in_spec = pl.BlockSpec((block_rows, lanes), lambda i: (i, 0))
    partials = pl.pallas_call(
        functools.partial(_partial_sum_kernel, beta=beta, grp=grp,
                          block_rows=block_rows, rows_total=rows),
        out_shape=jax.ShapeDtypeStruct((num_blocks * 8, lanes), jnp.float32),
        grid=(num_blocks,),
        in_specs=[in_spec, in_spec],
        out_specs=pl.BlockSpec((8, lanes), lambda i: (i, 0)),
        compiler_params=pltpu.CompilerParams(
            dimension_semantics=("parallel",),
            vmem_limit_bytes=cfg["vmem_ceiling"]),
    )(p2d, t2d)

    total = jnp.sum(partials, dtype=jnp.float32)
    if rem:
        total = total + jnp.sum(
            _smooth_l1_elem(tail_p.astype(jnp.float32),
                            tail_t.astype(jnp.float32), beta),
            dtype=jnp.float32)
    if reduction == 'mean':
        total = total / jnp.float32(n)
    return (weight * total).astype(orig_dtype)


class SmoothL1Loss:
    """JAX/Pallas equivalent of the PyTorch SmoothL1Loss module."""

    def __init__(self, beta=1.0, reduction='mean', weight=1.0):
        self.beta = beta
        self.reduction = reduction
        self.weight = weight

    def __call__(self, predictions, targets):
        return smooth_l1_loss(predictions, targets, beta=self.beta,
                              reduction=self.reduction, weight=self.weight)


# --------------------------------------------------------------------------
# Reference & self-test
# --------------------------------------------------------------------------
def _reference(pred, tgt, beta, reduction, weight):
    pred = pred.astype(jnp.float32)
    tgt = tgt.astype(jnp.float32)
    diff = pred - tgt
    absd = jnp.abs(diff)
    if beta == 0.0:
        loss = absd
    else:
        loss = jnp.where(absd < beta, 0.5 * diff * diff / beta,
                         absd - 0.5 * beta)
    if reduction == 'mean':
        loss = jnp.mean(loss)
    elif reduction == 'sum':
        loss = jnp.sum(loss)
    return weight * loss


if __name__ == "__main__":
    key = jax.random.PRNGKey(0)
    k1, k2, k3, k4, k5, k6 = jax.random.split(key, 6)

    # Primary small NCHW-like tensors (batch=2, channels=4, spatial=16x16).
    shape = (2, 4, 16, 16)
    predictions = jax.random.normal(k1, shape, dtype=jnp.float32)
    targets = jax.random.normal(k2, shape, dtype=jnp.float32)

    out = jax.block_until_ready(
        SmoothL1Loss(beta=1.0, reduction='mean', weight=1.0)(predictions, targets))
    ref = _reference(predictions, targets, 1.0, 'mean', 1.0)
    assert jnp.allclose(out, ref, rtol=1e-5, atol=1e-5), (out, ref)

    out_sum = jax.block_until_ready(
        SmoothL1Loss(reduction='sum', weight=2.0)(predictions, targets))
    assert jnp.allclose(out_sum, _reference(predictions, targets, 1.0, 'sum', 2.0),
                        rtol=1e-4, atol=1e-2)

    out_none = jax.block_until_ready(
        SmoothL1Loss(beta=0.5, reduction='none', weight=3.0)(predictions, targets))
    assert out_none.shape == shape and out_none.dtype == predictions.dtype
    assert jnp.allclose(out_none, _reference(predictions, targets, 0.5, 'none', 3.0),
                        rtol=1e-5, atol=1e-5)

    # Tiny lane-ragged input: plain-JAX fallback path.
    p2 = jax.random.normal(k3, (3, 5, 7), dtype=jnp.float32)
    t2 = jax.random.normal(k4, (3, 5, 7), dtype=jnp.float32)
    assert jnp.allclose(jax.block_until_ready(SmoothL1Loss()(p2, t2)),
                        _reference(p2, t2, 1.0, 'mean', 1.0),
                        rtol=1e-5, atol=1e-5)

    # Medium input: multi-block grid (>= 2 blocks for 2-TC chips).
    p3 = jax.random.normal(k1, (600, 1024), dtype=jnp.float32)
    t3 = jax.random.normal(k2, (600, 1024), dtype=jnp.float32)
    assert jnp.allclose(jax.block_until_ready(
                            SmoothL1Loss(reduction='sum')(p3, t3)),
                        _reference(p3, t3, 1.0, 'sum', 1.0),
                        rtol=1e-4, atol=1e-2)
    assert jnp.allclose(jax.block_until_ready(
                            SmoothL1Loss(reduction='none')(p3, t3)),
                        _reference(p3, t3, 1.0, 'none', 1.0),
                        rtol=1e-5, atol=1e-5)

    # Large ragged input: kernel on the 128-aligned prefix, tail in JAX.
    p4 = jax.random.normal(k5, (129, 517), dtype=jnp.float32)
    t4 = jax.random.normal(k6, (129, 517), dtype=jnp.float32)
    assert jnp.allclose(jax.block_until_ready(
                            SmoothL1Loss(reduction='sum')(p4, t4)),
                        _reference(p4, t4, 1.0, 'sum', 1.0),
                        rtol=1e-4, atol=1e-2)
    assert jnp.allclose(jax.block_until_ready(
                            SmoothL1Loss(reduction='none')(p4, t4)),
                        _reference(p4, t4, 1.0, 'none', 1.0),
                        rtol=1e-5, atol=1e-5)

    # bf16 input: dtype-scaled blocks and 16-row sublane groups.
    p5 = jax.random.normal(k3, (256, 512), dtype=jnp.bfloat16)
    t5 = jax.random.normal(k4, (256, 512), dtype=jnp.bfloat16)
    out5 = jax.block_until_ready(SmoothL1Loss(reduction='mean')(p5, t5))
    ref5 = _reference(p5, t5, 1.0, 'mean', 1.0)
    assert out5.dtype == jnp.bfloat16
    assert jnp.allclose(out5.astype(jnp.float32), ref5, rtol=2e-2, atol=2e-2)

    print("KERNEL_OK")
</pallas_src>

<mosaic_0001>
module attributes {stable_mosaic.version = 11 : i64} {
  func.func @_partial_sum_kernel(%arg0: i32, %arg1: memref<8x256xf32, #tpu.memory_space<vmem>>, %arg2: memref<8x256xf32, #tpu.memory_space<vmem>>, %arg3: memref<8x256xf32, #tpu.memory_space<vmem>>) attributes {dimension_semantics = [#tpu.dimension_semantics<parallel>], iteration_bounds = array<i64: 1>, scalar_prefetch = 0 : i64, scratch_operands = 0 : i64, tpu.core_type = #tpu.core_type<tc>, window_params = [{transform_indices = @transform_0, window_bounds = array<i64: 8, 256>}, {transform_indices = @transform_1, window_bounds = array<i64: 8, 256>}, {transform_indices = @transform_2, window_bounds = array<i64: 8, 256>}]} {
    %c0 = arith.constant 0 : index
    %c0_0 = arith.constant 0 : index
    %0 = vector.load %arg1[%c0, %c0_0] : memref<8x256xf32, #tpu.memory_space<vmem>>, vector<8x256xf32>
    %c0_1 = arith.constant 0 : index
    %c0_2 = arith.constant 0 : index
    %1 = vector.load %arg2[%c0_1, %c0_2] : memref<8x256xf32, #tpu.memory_space<vmem>>, vector<8x256xf32>
    %2 = arith.subf %0, %1 : vector<8x256xf32>
    %3 = math.absf %2 : vector<8x256xf32>
    %cst = arith.constant 1.000000e+00 : f32
    %4 = vector.broadcast %cst : f32 to vector<8x256xf32>
    %5 = arith.cmpf olt, %3, %4 : vector<8x256xf32>
    %6 = arith.mulf %2, %2 : vector<8x256xf32>
    %cst_3 = arith.constant 5.000000e-01 : f32
    %7 = vector.broadcast %cst_3 : f32 to vector<8x256xf32>
    %8 = arith.mulf %6, %7 : vector<8x256xf32>
    %cst_4 = arith.constant 5.000000e-01 : f32
    %9 = vector.broadcast %cst_4 : f32 to vector<8x256xf32>
    %10 = arith.subf %3, %9 : vector<8x256xf32>
    %11 = arith.select %5, %8, %10 : vector<8x256xi1>, vector<8x256xf32>
    %c0_5 = arith.constant 0 : index
    %c0_6 = arith.constant 0 : index
    %12 = vector.load %arg3[%c0_5, %c0_6] : memref<8x256xf32, #tpu.memory_space<vmem>>, vector<8x256xf32>
    tpu.vector_store %arg3[%c0_5, %c0_6], %11 {strides = array<i32>} : memref<8x256xf32, #tpu.memory_space<vmem>>, vector<8x256xf32>,
    return
  }
  func.func @transform_0(%arg0: i32) -> (i32, i32) {
    %c0_i32 = arith.constant 0 : i32
    %c0_i32_0 = arith.constant 0 : i32
    return %arg0, %c0_i32 : i32, i32
  }
  func.func @transform_1(%arg0: i32) -> (i32, i32) {
    %c0_i32 = arith.constant 0 : i32
    %c0_i32_0 = arith.constant 0 : i32
    return %arg0, %c0_i32 : i32, i32
  }
  func.func @transform_2(%arg0: i32) -> (i32, i32) {
    %c0_i32 = arith.constant 0 : i32
    %c0_i32_0 = arith.constant 0 : i32
    return %arg0, %c0_i32 : i32, i32
  }
}

</mosaic_0001>

<bundles_post_ra>
// kernel: tpu_custom_call.1
= control target key start
LH: loop header
LB: loop body
LE: loop exit
PB: predicated region body
PF: predicated region fallthrough
CT: control target
= control target key end

     0   :  { %7 = vsyncpa [#allocation3], 0  ;;  %s188_s0 = inlined_call_operand.hbm [shape: f32[8,256], index: 0, kind: input, shape index: {}]   ;;  %s189_s1 = inlined_call_operand.hbm [shape: f32[8,256], index: 1, kind: input, shape index: {}]   ;;  %s190_s2 = inlined_call_operand.hbm [shape: f32[8,256], index: 2, kind: output, shape index: {}]  }
   0x1   :  { %8 = vsyncpa [#allocation6], 0 }
   0x2   :  { %9 = vsyncpa [#allocation4], 0  ;;  %s15_s11 = sshll.u32 %s188_s0, 4  ;;  %s161_s12 = smov [#allocation2]   ;;  %s16_s11 = int_to_ptr.hbm [resolvable:$true] %s15_s11 }
   0x3   :  { %s17_s13 = sshll.u32 %s161_s12, 4  ;;  %s26_s16 = sshll.u32 %s189_s1, 4  ;;  %s18_s13 = int_to_ptr.vmem [resolvable:$true] %s17_s13  ;;  %s27_s16 = int_to_ptr.hbm [resolvable:$true] %s26_s16 }
   0x4   :  { %20 = dma.hbm_to_vmem [thread:$0]  %s16_s11, 256, %s18_s13, [#allocation3]  }
   0x5   :  { %s162_s17 = smov [#allocation5]  }
   0x6   :  { %s28_s18 = sshll.u32 %s162_s17, 4  ;;  %s29_s18 = int_to_ptr.vmem [resolvable:$true] %s28_s18 }
   0x7   :  { %31 = dma.hbm_to_vmem [thread:$0]  %s27_s16, 256, %s29_s18, [#allocation6]  }
   0x8   :  { %155 = dma.done.wait [#allocation3], 256  }
   0x9   :  { %156 = vsyncadd [#allocation3], 4294967040 }
   0xa   :  { %157 = dma.done.wait [#allocation6], 256  }
   0xb   :  { %158 = vsyncadd [#allocation6], 4294967040  ;;  %v40_v0 = vld [vmem:[#allocation2] sm:$0xff]  ;;  %v42_v1 = vld [vmem:[#allocation5] sm:$0xff]  ;;  %s163_s0 = smov [#allocation7]   ;;  %s67_s21 = sshll.u32 %s190_s2, 4  ;;  %s68_s21 = int_to_ptr.hbm [resolvable:$true] %s67_s21 }
   0xc   :  { %v41_v2 = vld [vmem:[#allocation2 + $0x8] sm:$0xff]  ;;  %v44_v3 = vsub.f32 %v40_v0, %v42_v1  ;;  %v43_v4 = vld [vmem:[#allocation5 + $0x8] sm:$0xff]  ;;  %s65_s1 = sshll.u32 %s163_s0, 4  ;;  %s66_s1 = int_to_ptr.vmem [resolvable:$true] %s65_s1 }
   0xd   :  { %v45_v5 = vsub.f32 %v41_v2, %v43_v4 }
   0xe   :  { %v46_v6 = vand.u32 2147483647, %v44_v3  ;;  %v50_v7 = vmul.f32 %v44_v3, %v44_v3 }
   0xf   :  { %v47_v8 = vand.u32 2147483647, %v45_v5  ;;  %v51_v9 = vmul.f32 %v45_v5, %v45_v5 }
  0x10   :  { %vm48_vm0 = vcmp.lt.f32.partialorder %v46_v6, 1.0  ;;  %v52_v10 = vmul.f32 0.5, %v50_v7  ;;  %v78_v11 = vadd.f32 -0.5, %v46_v6 }
  0x11   :  { %vm49_vm1 = vcmp.lt.f32.partialorder %v47_v8, 1.0  ;;  %v53_v12 = vmul.f32 0.5, %v51_v9  ;;  %v79_v13 = vadd.f32 -0.5, %v47_v8 }
  0x12   :  { %v56_v14 = vsel %vm48_vm0, %v52_v10, %v78_v11 }
  0x13   :  { %58 = vst [vmem:[#allocation7] sm:$0xff] %v56_v14  ;;  %v57_v15 = vsel %vm49_vm1, %v53_v12, %v79_v13 }
  0x14   :  { %59 = vst [vmem:[#allocation7 + $0x8] sm:$0xff] %v57_v15 }
  0x15   :  { %70 = dma.vmem_to_hbm [thread:$0]  %s66_s1, 256, %s68_s21, [#allocation4]  }
  0x16   :  { %159 = dma.done.wait [#allocation4], 256  }
  0x17   :  { %160 = vsyncadd [#allocation4], 4294967040 }
  0x18   :  { %75 = vsyncpa [#allocation3], 1 }
  0x19   :  { %76 = vsyncpa [#allocation6], 1 }
  0x1a   :  { %77 = vsyncpa [#allocation4], 1 }

</bundles_post_ra>
